<compile_context>
chip_gen: v7x
topology: tpu7x:2x2x1
jax: 0.10.0
libtpu: 0.0.40
codegen_flags: <defaults>
</compile_context>

<pallas_src>
import jax
import jax.numpy as jnp
from jax.experimental import pallas as pl
from jax.experimental.pallas import tpu as pltpu

LANE = 128          # TPU lane width: output-layer weights/bias padded to this
NEG_BIG = -1e30     # logit value for padded output lanes -> exp() == 0 in softmax


def _round_up(n, m):
    return ((n + m - 1) // m) * m


def _cdiv(a, b):
    return (a + b - 1) // b


def policy_kernel(x_ref, w1_ref, b1_ref, w2_ref, b2_ref, o_ref):
    # Hidden layer: in-kernel bf16 cast of x, bf16 x bf16 MXU matmul, f32 accumulate.
    x = x_ref[...].astype(jnp.bfloat16)
    h = jnp.dot(x, w1_ref[...], preferred_element_type=jnp.float32)
    h = jnp.maximum(h + b1_ref[...], 0.0)                      # bias + ReLU in f32
    # Output layer (lane-padded to 128 columns; padded lanes carry a -1e30 bias).
    logits = jnp.dot(h.astype(jnp.bfloat16), w2_ref[...],
                     preferred_element_type=jnp.float32)
    logits = logits + b2_ref[...]
    # Numerically stable softmax over the padded lane dim; padded lanes -> exp == 0.
    m = jnp.max(logits, axis=-1, keepdims=True)
    e = jnp.exp(logits - m)
    denom = jnp.sum(e, axis=-1, keepdims=True)
    r = pl.reciprocal(denom, approx=True)                      # EUP vrcp slot
    r = r * (2.0 - denom * r)                                  # one Newton step -> ~f32 accuracy
    probs = e * r
    # Store only the real output columns (narrow masked store, 16x fewer HBM bytes).
    o_ref[...] = probs[:, :o_ref.shape[1]].astype(o_ref.dtype)


def prepare_params(w1, b1, w2, b2):
    """One-time parameter preparation (hoisted out of the per-call forward path)."""
    in_dim, hid = w1.shape
    out_dim = w2.shape[1]
    o_pad = _round_up(out_dim, LANE)
    w1_b = w1.astype(jnp.bfloat16)
    b1_f = b1.reshape(1, hid).astype(jnp.float32)
    w2_p = jnp.zeros((hid, o_pad), jnp.bfloat16).at[:, :out_dim].set(w2.astype(jnp.bfloat16))
    b2_p = jnp.full((1, o_pad), NEG_BIG, jnp.float32).at[:, :out_dim].set(
        b2.reshape(1, out_dim).astype(jnp.float32))
    return {"w1": w1_b, "b1": b1_f, "w2": w2_p, "b2": b2_p, "out_dim": out_dim}


def policy_network_forward(x, params, *, block_batch=512):
    B, IN = x.shape
    w1, b1, w2, b2 = params["w1"], params["b1"], params["w2"], params["b2"]
    O = params["out_dim"]
    H = w1.shape[1]
    O_pad = w2.shape[1]

    # Grid-step count: enough steps that a tile fits block_batch rows, at least 2 so
    # both v7x TensorCores receive work, never more than one step per 8 rows.  Tiles
    # are balanced (cdiv) so an "unlucky" B (e.g. 260) doesn't pad up to 2x the work.
    nsteps = max(2, _cdiv(B, block_batch))
    nsteps = max(1, min(nsteps, _cdiv(B, 8)))
    TB = _round_up(_cdiv(B, nsteps), 8)         # multiple of 8 sublanes
    nb = _cdiv(B, TB)                           # last block may be partial (masked store)

    cost = pl.CostEstimate(
        flops=2 * nb * TB * (IN * H + H * O_pad),
        transcendentals=nb * TB * (O_pad + 1),                  # exp + reciprocal
        bytes_accessed=(B * IN * 4 + w1.size * 2 + w2.size * 2
                        + b1.size * 4 + b2.size * 4 + B * O * 4),
    )

    return pl.pallas_call(
        policy_kernel,
        out_shape=jax.ShapeDtypeStruct((B, O), jnp.float32),
        grid=(nb,),
        in_specs=[
            pl.BlockSpec((TB, IN), lambda i: (i, 0)),      # x: tiled over batch, pipelined
            pl.BlockSpec((IN, H), lambda i: (0, 0)),       # w1: VMEM-resident across grid
            pl.BlockSpec((1, H), lambda i: (0, 0)),        # b1: resident
            pl.BlockSpec((H, O_pad), lambda i: (0, 0)),    # w2 (lane-padded): resident
            pl.BlockSpec((1, O_pad), lambda i: (0, 0)),    # b2 (lane-padded): resident
        ],
        out_specs=pl.BlockSpec((TB, O), lambda i: (i, 0)), # narrow (B, O) store, no post-slice
        compiler_params=pltpu.CompilerParams(
            dimension_semantics=("parallel",)),            # megacore shard on v7x
        cost_estimate=cost,
    )(x, w1, b1, w2, b2)


def init_params(key, input_dim, hidden_dim, output_dim):
    # Deterministic init mimicking PyTorch nn.Linear default (uniform +/- 1/sqrt(fan_in)).
    k1, k2, k3, k4 = jax.random.split(key, 4)
    bound1 = 1.0 / jnp.sqrt(input_dim)
    w1 = jax.random.uniform(k1, (input_dim, hidden_dim), jnp.float32, -bound1, bound1)
    b1 = jax.random.uniform(k2, (1, hidden_dim), jnp.float32, -bound1, bound1)
    bound2 = 1.0 / jnp.sqrt(hidden_dim)
    w2 = jax.random.uniform(k3, (hidden_dim, output_dim), jnp.float32, -bound2, bound2)
    b2 = jax.random.uniform(k4, (1, output_dim), jnp.float32, -bound2, bound2)
    return w1, b1, w2, b2


def _reference(x, w1, b1, w2, b2):
    h = jnp.maximum(x @ w1 + b1, 0.0)
    return jax.nn.softmax(h @ w2 + b2, axis=-1)


if __name__ == "__main__":
    key = jax.random.PRNGKey(0)
    k_p, k_small, k_mid, k_big = jax.random.split(key, 4)

    input_dim, hidden_dim, output_dim = 32, 128, 8
    w1, b1, w2, b2 = init_params(k_p, input_dim, hidden_dim, output_dim)
    params = prepare_params(w1, b1, w2, b2)            # one-time prep, reused every call

    def check(x):
        out = jax.block_until_ready(policy_network_forward(x, params))
        ref = _reference(x, w1, b1, w2, b2)
        assert out.shape == ref.shape
        # bf16 matmul operands (f32 accumulate) -> loosened tolerance vs f32 reference.
        assert jnp.allclose(out, ref, atol=2e-2), f"mismatch at batch={x.shape[0]}"
        assert jnp.allclose(jnp.sum(out, axis=-1), 1.0, atol=1e-4)

    # Small batch (single grid step).
    check(jax.random.normal(k_small, (8, input_dim), jnp.float32))
    # Non-divisible batch: 2 balanced tiles of 104 rows, partial (masked) trailing block.
    check(jax.random.normal(k_mid, (200, input_dim), jnp.float32))
    # Larger batch: 2 full 256-row tiles (exercises the tiled grid / megacore path).
    check(jax.random.normal(k_big, (512, input_dim), jnp.float32))

    print("KERNEL_OK")
</pallas_src>

<mosaic_0001>
module attributes {stable_mosaic.version = 11 : i64} {
  func.func @policy_kernel(%arg0: i32, %arg1: memref<8x32xf32, #tpu.memory_space<vmem>>, %arg2: memref<32x128xbf16, #tpu.memory_space<vmem>>, %arg3: memref<1x128xf32, #tpu.memory_space<vmem>>, %arg4: memref<128x128xbf16, #tpu.memory_space<vmem>>, %arg5: memref<1x128xf32, #tpu.memory_space<vmem>>, %arg6: memref<8x8xf32, #tpu.memory_space<vmem>>) attributes {dimension_semantics = [#tpu.dimension_semantics<parallel>], iteration_bounds = array<i64: 1>, scalar_prefetch = 0 : i64, scratch_operands = 0 : i64, tpu.core_type = #tpu.core_type<tc>, window_params = [{transform_indices = @transform_0, window_bounds = array<i64: 8, 32>}, {pipeline_mode = #tpu.pipeline_mode<synchronous>, transform_indices = @transform_1, window_bounds = array<i64: 32, 128>}, {pipeline_mode = #tpu.pipeline_mode<synchronous>, transform_indices = @transform_2, window_bounds = array<i64: 1, 128>}, {pipeline_mode = #tpu.pipeline_mode<synchronous>, transform_indices = @transform_3, window_bounds = array<i64: 128, 128>}, {pipeline_mode = #tpu.pipeline_mode<synchronous>, transform_indices = @transform_4, window_bounds = array<i64: 1, 128>}, {transform_indices = @transform_5, window_bounds = array<i64: 8, 8>}]} {
    %c0 = arith.constant 0 : index
    %c0_0 = arith.constant 0 : index
    %0 = vector.load %arg1[%c0, %c0_0] : memref<8x32xf32, #tpu.memory_space<vmem>>, vector<8x32xf32>
    %1 = arith.truncf %0 : vector<8x32xf32> to vector<8x32xbf16>
    %c0_1 = arith.constant 0 : index
    %c0_2 = arith.constant 0 : index
    %2 = vector.load %arg2[%c0_1, %c0_2] : memref<32x128xbf16, #tpu.memory_space<vmem>>, vector<32x128xbf16>
    %cst = arith.constant dense<0.000000e+00> : vector<8x128xf32>
    %3 = tpu.matmul %1, %2, %cst {dimension_numbers = #tpu.dot_dimension_numbers<[1], [0], [0], [1], [0, 0, 1, 1], [], []>} : vector<8x32xbf16>, vector<32x128xbf16>, vector<8x128xf32> -> vector<8x128xf32>
    %c0_3 = arith.constant 0 : index
    %c0_4 = arith.constant 0 : index
    %4 = vector.load %arg3[%c0_3, %c0_4] : memref<1x128xf32, #tpu.memory_space<vmem>>, vector<1x128xf32>
    %5 = vector.broadcast %4 : vector<1x128xf32> to vector<8x128xf32>
    %6 = arith.addf %3, %5 : vector<8x128xf32>
    %cst_5 = arith.constant 0.000000e+00 : f32
    %7 = vector.broadcast %cst_5 : f32 to vector<8x128xf32>
    %8 = arith.maximumf %6, %7 : vector<8x128xf32>
    %9 = arith.truncf %8 : vector<8x128xf32> to vector<8x128xbf16>
    %c0_6 = arith.constant 0 : index
    %c0_7 = arith.constant 0 : index
    %10 = vector.load %arg4[%c0_6, %c0_7] : memref<128x128xbf16, #tpu.memory_space<vmem>>, vector<128x128xbf16>
    %cst_8 = arith.constant dense<0.000000e+00> : vector<8x128xf32>
    %11 = tpu.matmul %9, %10, %cst_8 {dimension_numbers = #tpu.dot_dimension_numbers<[1], [0], [0], [1], [0, 0, 1, 1], [], []>} : vector<8x128xbf16>, vector<128x128xbf16>, vector<8x128xf32> -> vector<8x128xf32>
    %c0_9 = arith.constant 0 : index
    %c0_10 = arith.constant 0 : index
    %12 = vector.load %arg5[%c0_9, %c0_10] : memref<1x128xf32, #tpu.memory_space<vmem>>, vector<1x128xf32>
    %13 = vector.broadcast %12 : vector<1x128xf32> to vector<8x128xf32>
    %14 = arith.addf %11, %13 : vector<8x128xf32>
    %cst_11 = arith.constant dense<0xFF800000> : vector<8xf32>
    %15 = vector.multi_reduction <maximumf>, %14, %cst_11 [1] : vector<8x128xf32> to vector<8xf32>
    %16 = vector.shape_cast %15 : vector<8xf32> to vector<8x1xf32>
    %17 = vector.broadcast %16 : vector<8x1xf32> to vector<8x128xf32>
    %18 = arith.subf %14, %17 : vector<8x128xf32>
    %19 = math.exp %18 : vector<8x128xf32>
    %cst_12 = arith.constant dense<0.000000e+00> : vector<8xf32>
    %20 = vector.multi_reduction <add>, %19, %cst_12 [1] : vector<8x128xf32> to vector<8xf32>
    %21 = vector.shape_cast %20 : vector<8xf32> to vector<8x1xf32>
    %22 = tpu.reciprocal %21 {approx = true} : vector<8x1xf32> -> vector<8x1xf32>
    %23 = arith.mulf %21, %22 : vector<8x1xf32>
    %cst_13 = arith.constant 2.000000e+00 : f32
    %24 = vector.broadcast %cst_13 : f32 to vector<8x1xf32>
    %25 = arith.subf %24, %23 : vector<8x1xf32>
    %26 = arith.mulf %22, %25 : vector<8x1xf32>
    %27 = vector.broadcast %26 : vector<8x1xf32> to vector<8x128xf32>
    %28 = arith.mulf %19, %27 : vector<8x128xf32>
    %29 = vector.extract_strided_slice %28 {offsets = [0, 0], sizes = [8, 8], strides = [1, 1]} : vector<8x128xf32> to vector<8x8xf32>
    %c0_14 = arith.constant 0 : index
    %c0_15 = arith.constant 0 : index
    %30 = vector.load %arg6[%c0_14, %c0_15] : memref<8x8xf32, #tpu.memory_space<vmem>>, vector<8x8xf32>
    tpu.vector_store %arg6[%c0_14, %c0_15], %29 {strides = array<i32>} : memref<8x8xf32, #tpu.memory_space<vmem>>, vector<8x8xf32>,
    return
  }
  func.func @transform_0(%arg0: i32) -> (i32, i32) {
    %c0_i32 = arith.constant 0 : i32
    %c0_i32_0 = arith.constant 0 : i32
    return %arg0, %c0_i32 : i32, i32
  }
  func.func @transform_1(%arg0: i32) -> (i32, i32) {
    %c0_i32 = arith.constant 0 : i32
    %c0_i32_0 = arith.constant 0 : i32
    %c0_i32_1 = arith.constant 0 : i32
    return %c0_i32, %c0_i32_0 : i32, i32
  }
  func.func @transform_2(%arg0: i32) -> (i32, i32) {
    %c0_i32 = arith.constant 0 : i32
    %c0_i32_0 = arith.constant 0 : i32
    %c0_i32_1 = arith.constant 0 : i32
    return %c0_i32, %c0_i32_0 : i32, i32
  }
  func.func @transform_3(%arg0: i32) -> (i32, i32) {
    %c0_i32 = arith.constant 0 : i32
    %c0_i32_0 = arith.constant 0 : i32
    %c0_i32_1 = arith.constant 0 : i32
    return %c0_i32, %c0_i32_0 : i32, i32
  }
  func.func @transform_4(%arg0: i32) -> (i32, i32) {
    %c0_i32 = arith.constant 0 : i32
    %c0_i32_0 = arith.constant 0 : i32
    %c0_i32_1 = arith.constant 0 : i32
    return %c0_i32, %c0_i32_0 : i32, i32
  }
  func.func @transform_5(%arg0: i32) -> (i32, i32) {
    %c0_i32 = arith.constant 0 : i32
    %c0_i32_0 = arith.constant 0 : i32
    return %arg0, %c0_i32 : i32, i32
  }
}

</mosaic_0001>

<bundles_post_ra>
// kernel: tpu_custom_call.1
= control target key start
LH: loop header
LB: loop body
LE: loop exit
PB: predicated region body
PF: predicated region fallthrough
CT: control target
= control target key end

     0   :  { %10 = vsyncpa [#allocation3], 0  ;;  %s540_s0 = inlined_call_operand.hbm [shape: f32[8,32], index: 0, kind: input, shape index: {}]   ;;  %s541_s1 = inlined_call_operand.hbm [shape: bf16[32,128], index: 1, kind: input, shape index: {}]   ;;  %s542_s2 = inlined_call_operand.vmem [shape: f32[1,128], index: 2, kind: input, shape index: {}]   ;;  %s543_s3 = inlined_call_operand.hbm [shape: bf16[128,128], index: 3, kind: input, shape index: {}]   ;;  %s544_s4 = inlined_call_operand.vmem [shape: f32[1,128], index: 4, kind: input, shape index: {}]   ;;  %s545_s5 = inlined_call_operand.hbm [shape: f32[8,8], index: 5, kind: output, shape index: {}]  }
   0x1   :  { %11 = vsyncpa [#allocation6], 0 }
   0x2   :  { %12 = vsyncpa [#allocation4], 0  ;;  %s442_s18 = smov [#allocation5]   ;;  %s348_s22 = scalar_lea.hbm %s541_s1, 256 }
   0x3   :  { %s28_s19 = sshll.u32 %s442_s18, 4  ;;  %p349_p0 = scmp.ne.s32.totalorder %s541_s1, %s348_s22  ;;  %s29_s19 = int_to_ptr.vmem [resolvable:$true] %s28_s19 }
   0x4   :  { %p352_p1 = scmp.lt.u32.totalorder %s348_s22, %s541_s1 }
   0x6   :  { %p354_p2 = pnand %p352_p1, %p349_p0 }
   0x8   :  { %357 = shalt.err (!%p354_p2)
}
   0x9   :  { %s358_s27 = scalar_lea.vmem %s29_s19, 256  ;;  %p363_p4 = scmp.lt.s32.totalorder %s29_s19, %s29_s19 }
   0xa   :  { %p359_p3 = scmp.ne.s32.totalorder %s29_s19, %s358_s27  ;;  %p364_p5 = scmp.lt.s32.totalorder %s358_s27, %s358_s27 }
   0xc   :  { %p365_p6 = por %p364_p5, %p363_p4 }
   0xe   :  { %p366_p7 = pnand %p365_p6, %p359_p3 }
  0x10   :  { %369 = shalt.err (!%p366_p7)
}
  0x11   :  { %s443_s28 = smov 64   ;;  %s444_s29 = smov 4  }
  0x12   :  { %34 = dma.hbm_to_vmem [thread:$0]  %s541_s1, 256, %s29_s19, [#allocation6], %s443_s28, %s443_s28, %s444_s29  }
  0x13   :  { %s445_s7 = smov [#allocation2]   ;;  %s446_s9 = smov [#allocation7]  }
  0x14   :  { %s19_s8 = sshll.u32 %s445_s7, 4  ;;  %s42_s10 = sshll.u32 %s446_s9, 4  ;;  %s20_s8 = int_to_ptr.vmem [resolvable:$true] %s19_s8  ;;  %s43_s10 = int_to_ptr.vmem [resolvable:$true] %s42_s10 }
  0x15   :  { %s370_s13 = scalar_lea.hbm %s540_s0, 128 }
  0x16   :  { %p371_p8 = scmp.ne.s32.totalorder %s540_s0, %s370_s13  ;;  %p374_p9 = scmp.lt.u32.totalorder %s370_s13, %s540_s0 }
  0x18   :  { %p376_p10 = pnand %p374_p9, %p371_p8 }
  0x1a   :  { %379 = shalt.err (!%p376_p10)
}
  0x1b   :  { %s380_s1 = scalar_lea.vmem %s20_s8, 128  ;;  %p385_p12 = scmp.lt.s32.totalorder %s20_s8, %s20_s8 }
  0x1c   :  { %p381_p11 = scmp.ne.s32.totalorder %s20_s8, %s380_s1  ;;  %p386_p13 = scmp.lt.s32.totalorder %s380_s1, %s380_s1 }
  0x1e   :  { %p387_p0 = por %p386_p13, %p385_p12 }
  0x20   :  { %p388_p1 = pnand %p387_p0, %p381_p11 }
  0x22   :  { %391 = shalt.err (!%p388_p1)
}
  0x23   :  { %22 = dma.hbm_to_vmem [thread:$0]  %s540_s0, 128, %s20_s8, [#allocation3]  }
  0x24   :  { %s392_s22 = scalar_lea.hbm %s543_s3, 1024 }
  0x25   :  { %p393_p2 = scmp.ne.s32.totalorder %s543_s3, %s392_s22  ;;  %p396_p3 = scmp.lt.u32.totalorder %s392_s22, %s543_s3 }
  0x27   :  { %p398_p4 = pnand %p396_p3, %p393_p2 }
  0x29   :  { %401 = shalt.err (!%p398_p4)
}
  0x2a   :  { %s402_s27 = scalar_lea.vmem %s43_s10, 1024  ;;  %p407_p6 = scmp.lt.s32.totalorder %s43_s10, %s43_s10 }
  0x2b   :  { %p403_p5 = scmp.ne.s32.totalorder %s43_s10, %s402_s27  ;;  %p408_p7 = scmp.lt.s32.totalorder %s402_s27, %s402_s27 }
  0x2d   :  { %p409_p8 = por %p408_p7, %p407_p6 }
  0x2f   :  { %p410_p9 = pnand %p409_p8, %p403_p5 }
  0x31   :  { %413 = shalt.err (!%p410_p9)
}
  0x32   :  { %48 = dma.hbm_to_vmem [thread:$0]  %s543_s3, 1024, %s43_s10, [#allocation6], %s443_s28, %s443_s28, %s444_s29  }
  0x33   :  { %436 = dma.done.wait [#allocation3], 128  }
  0x34   :  { %437 = vsyncadd [#allocation3], 4294967168 }
  0x35   :  { %438 = dma.done.wait [#allocation6], 1280  }
  0x36   :  { %439 = vsyncadd [#allocation6], 4294966016  ;;  %v447_v0 = vmov 0.0   ;;  %vm448_vm0 = vmmov 0   ;;  %v334_v1 = vld [vmem:[#allocation5] sm:$0xff]   ;;  %v335_v2 = vld [vmem:[#allocation5 + $0x8] sm:$0xff]  }
  0x37   :  { %298 = vmatprep.subr.bf16.mxu0 %v447_v0  ;;  %302 = vmatprep.mubr.msk.bf16.mxu0 %vm448_vm0, %v447_v0  ;;  %v61_v3 = vld [vmem:[#allocation2] sm:$0xff]  ;;  %v336_v4 = vld [vmem:[#allocation7] sm:$0xff]   ;;  %vm86_vm1 = vcmask 261120   ;;  %v338_v7 = vld [vmem:[#allocation7 + $0x10] sm:$0xff]   ;;  %vm255_vm2 = vcmask 64512  }
  0x38   :  { %306 = vmatprep.subr.bf16.mxu1 %v447_v0  ;;  %322 = vmatprep.mubr.msk.bf16.mxu1 %vm448_vm0, %v447_v0  ;;  %v62_v5 = vpack.c.bf16 %v61_v3, %v61_v3  ;;  %v337_v6 = vld [vmem:[#allocation7 + $0x8] sm:$0xff]   ;;  %v339_v8 = vld [vmem:[#allocation7 + $0x18] sm:$0xff]   ;;  %v340_v9 = vld [vmem:[#allocation7 + $0x20] sm:$0xff]  }
  0x39   :  { %299 = vmatpush3.bf16.msra.mxu0 %v334_v1  ;;  %307 = vmatpush3.bf16.msra.mxu1 %v336_v4  ;;  %v341_v10 = vld [vmem:[#allocation7 + $0x28] sm:$0xff]   ;;  %v342_v11 = vld [vmem:[#allocation7 + $0x30] sm:$0xff]   ;;  %v343_v12 = vld [vmem:[#allocation7 + $0x38] sm:$0xff]  }
  0x3a   :  { %300 = vmatprep.subr.bf16.mxu0 %v447_v0  ;;  %308 = vmatprep.subr.bf16.mxu1 %v447_v0  ;;  %v273_v13 = vld [vmem:[%s542_s2] ss:$0 sm:$0xff]  ;;  %s449_s2 = smov [#allocation8]  }
  0x3b   :  { %v277_v21 = vld [vmem:[%s544_s4] ss:$0 sm:$0xff]  ;;  %s263_s7 = sshll.u32 %s449_s2, 4  ;;  %s264_s7 = int_to_ptr.vmem [resolvable:$true] %s263_s7 }
  0x3c   :  { %s414_s4 = scalar_lea.vmem %s264_s7, 128  ;;  %p419_p11 = scmp.lt.s32.totalorder %s264_s7, %s264_s7 }
  0x3d   :  { %301 = vmatpush3.bf16.msra.mxu0 %v335_v2  ;;  %309 = vmatpush3.bf16.msra.mxu1 %v337_v6  ;;  %p415_p10 = scmp.ne.s32.totalorder %s264_s7, %s414_s4  ;;  %p420_p12 = scmp.lt.s32.totalorder %s414_s4, %s414_s4 }
  0x3e   :  { %310 = vmatprep.subr.bf16.mxu1 %v447_v0 }
  0x3f   :  { %p421_p13 = por %p420_p12, %p419_p11 }
  0x40   :  { %303 = vmatmul.mubr.msk.bf16.vlgmr.msra.gmra.mrb[0].mxu0 %vm86_vm1, %v62_v5 }
  0x41   :  { %311 = vmatpush3.bf16.msra.mxu1 %v338_v7  ;;  %p422_p0 = pnand %p421_p13, %p415_p10 }
  0x42   :  { %312 = vmatprep.subr.bf16.mxu1 %v447_v0 }
  0x45   :  { %313 = vmatpush3.bf16.msra.mxu1 %v339_v8 }
  0x46   :  { %314 = vmatprep.subr.bf16.mxu1 %v447_v0 }
  0x49   :  { %315 = vmatpush3.bf16.msra.mxu1 %v340_v9 }
  0x4a   :  { %316 = vmatprep.subr.bf16.mxu1 %v447_v0 }
  0x4d   :  { %317 = vmatpush3.bf16.msra.mxu1 %v341_v10 }
  0x4e   :  { %318 = vmatprep.subr.bf16.mxu1 %v447_v0 }
  0x51   :  { %319 = vmatpush3.bf16.msra.mxu1 %v342_v11 }
  0x52   :  { %320 = vmatprep.subr.bf16.mxu1 %v447_v0 }
  0x55   :  { %321 = vmatpush3.bf16.msra.mxu1 %v343_v12 }
 0x113   :  { %v124_v14 = vpop.f32.mrb[0].mxu0 }
 0x114   :  { %v125_v15 = vadd.f32 %v273_v13, %v124_v14  ;;  %v304_v16 = vpop.f32.mrb[1].mxu0 }
 0x115   :  { %v127_v17 = vpop.f32.mrb[2].mxu0 }
 0x116   :  { %v130_v18 = vmax.f32 %v125_v15, 0.0  ;;  %v305_v19 = vpop.f32.mrb[3].mxu0 }
 0x118   :  { %v131_v20 = vpack.c.bf16 %v130_v18, %v130_v18 }
 0x11a   :  { %323 = vmatmul.mubr.bf16.vlgmr.msra.gmra.mrb[0].mxu1 %v131_v20 }
 0x1ed   :  { %v237_v22 = vpop.f32.mrb[0].mxu1 }
 0x1ee   :  { %v238_v23 = vadd.f32 %v277_v21, %v237_v22  ;;  %v324_v24 = vpop.f32.mrb[1].mxu1 }
 0x1ef   :  { %v240_v25 = vpop.f32.mrb[2].mxu1 }
 0x1f0   :  { %243 = vmax.xlane.f32.xlu0 %v238_v23  ;;  %v325_v26 = vpop.f32.mrb[3].mxu1 }
 0x27d   :  { %v244_v27 = vpop.xlane.xlu0 %243 }
 0x27e   :  { %v245_v28 = vsub.f32 %v238_v23, %v244_v27 }
 0x280   :  { %v246_v29 = vmul.f32 1.442695, %v245_v28 }
 0x282   :  { %344 = vpow2.f32 %v246_v29 }
 0x28c   :  { %v345_v30 = vpop.eup %344 }
 0x28d   :  { %248 = vadd.xlane.f32.xlu0 %v345_v30 }
 0x31a   :  { %v249_v31 = vpop.xlane.xlu0 %248 }
 0x31b   :  { %346 = vrcp.f32 %v249_v31 }
 0x325   :  { %v347_v32 = vpop.eup %346 }
 0x326   :  { %v251_v33 = vmul.f32 %v347_v32, %v249_v31 }
 0x328   :  { %v252_v34 = vsub.f32 2.0, %v251_v33 }
 0x32a   :  { %v253_v35 = vmul.f32 %v347_v32, %v252_v34 }
 0x32c   :  { %v254_v36 = vmul.f32 %v345_v30, %v253_v35 }
 0x32e   :  { %256 = vst.msk [vmem:[#allocation8] sm:$0xff] %vm255_vm2, %v254_v36 }
 0x32f   :  { %425 = shalt.err (!%p422_p0)
}
 0x330   :  { %s426_s10 = scalar_lea.hbm %s545_s5, 128 }
 0x331   :  { %p427_p1 = scmp.ne.s32.totalorder %s545_s5, %s426_s10  ;;  %p430_p2 = scmp.lt.u32.totalorder %s426_s10, %s545_s5 }
 0x333   :  { %p432_p3 = pnand %p430_p2, %p427_p1 }
 0x335   :  { %435 = shalt.err (!%p432_p3)
}
 0x336   :  { %266 = dma.vmem_to_hbm [thread:$0]  %s264_s7, 128, %s545_s5, [#allocation4]  }
 0x337   :  { %440 = dma.done.wait [#allocation4], 128  }
 0x338   :  { %441 = vsyncadd [#allocation4], 4294967168 }
 0x339   :  { %270 = vsyncpa [#allocation3], 1 }
 0x33a   :  { %271 = vsyncpa [#allocation6], 1 }
 0x33b   :  { %272 = vsyncpa [#allocation4], 1 }

</bundles_post_ra>
